<compile_context>
chip_gen: v5e
topology: v5e:2x2
jax: 0.10.0
libtpu: 0.0.40
codegen_flags: <defaults>
</compile_context>

<pallas_src>
import math

import numpy as np
import jax
import jax.numpy as jnp
from jax import lax
from jax.experimental import pallas as pl
from jax.experimental.pallas import tpu as pltpu


# ----------------------------------------------------------------------------------
# Kernel 1: 3x3 conv (stride 1, pad 1) + folded BN + ReLU   (DeformConv.forward)
# ----------------------------------------------------------------------------------
def conv3x3_bn_relu_kernel(x_ref, w_ref, s_ref, b_ref, o_ref, pad_ref):
    """One batch element per grid step.

    x_ref  : (1, H, W, Cin)
    w_ref  : (3, 3, Cin, Cout)   HWIO
    s_ref  : (1, Cout)           folded BN scale
    b_ref  : (1, Cout)           folded (conv bias + BN) bias
    o_ref  : (1, H, W, Cout)
    pad_ref: VMEM (3, H+2, Wpad, Cin)  -- plane t holds the zero-padded input
             pre-shifted by t columns, so every matmul operand is a contiguous
             full-width row block (no strided per-tap window reads).
    """
    H, W, Cin = x_ref.shape[1], x_ref.shape[2], x_ref.shape[3]
    Cout = w_ref.shape[3]
    Wpad = pad_ref.shape[2]

    x = x_ref[0]  # (H, W, Cin)

    # Zero only the thin borders that the valid output columns actually read;
    # everything else is rewritten below (no reliance on scratch persistence,
    # so the batch grid axis can be "parallel").
    pad_ref[:, 0:1, :, :] = jnp.zeros((3, 1, Wpad, Cin), jnp.float32)
    pad_ref[:, H + 1:H + 2, :, :] = jnp.zeros((3, 1, Wpad, Cin), jnp.float32)
    pad_ref[0, 1:H + 1, 0:1, :] = jnp.zeros((H, 1, Cin), jnp.float32)
    pad_ref[2, 1:H + 1, W - 1:W, :] = jnp.zeros((H, 1, Cin), jnp.float32)

    # plane t column x == zero-padded input column (x + t)
    pad_ref[0, 1:H + 1, 1:W + 1, :] = x
    pad_ref[1, 1:H + 1, 0:W, :] = x
    pad_ref[2, 1:H + 1, 0:W - 1, :] = x[:, 1:W, :]

    # 9 MXU matmuls over contiguous (H*Wpad, Cin) row blocks.
    acc = jnp.zeros((H * Wpad, Cout), jnp.float32)
    for ky in range(3):
        for t in range(3):  # t == kx
            rows = pad_ref[t, ky:ky + H, :, :].reshape(H * Wpad, Cin)
            acc = acc + jnp.dot(rows, w_ref[ky, t],
                                preferred_element_type=jnp.float32)

    # Folded BN + ReLU epilogue, then crop the padded width and store.
    y = jnp.maximum(acc * s_ref[...] + b_ref[...], 0.0)       # (H*Wpad, Cout)
    y = y.reshape(H, Wpad, Cout)[:, :W, :]
    o_ref[...] = y.reshape(1, H, W, Cout)


@jax.jit
def conv3x3_bn_relu(x, w_hwio, scale, bias):
    """x: (N, H, W, Cin) f32 -> (N, H, W, Cout) f32."""
    N, H, W, Cin = x.shape
    Cout = w_hwio.shape[-1]
    Wpad = ((W + 2 + 7) // 8) * 8
    s2 = scale.reshape(1, Cout).astype(jnp.float32)
    b2 = bias.reshape(1, Cout).astype(jnp.float32)
    return pl.pallas_call(
        conv3x3_bn_relu_kernel,
        out_shape=jax.ShapeDtypeStruct((N, H, W, Cout), jnp.float32),
        grid_spec=pltpu.PrefetchScalarGridSpec(
            num_scalar_prefetch=0,
            grid=(N,),
            in_specs=[
                pl.BlockSpec((1, H, W, Cin), lambda n: (n, 0, 0, 0)),
                pl.BlockSpec((3, 3, Cin, Cout), lambda n: (0, 0, 0, 0)),
                pl.BlockSpec((1, Cout), lambda n: (0, 0)),
                pl.BlockSpec((1, Cout), lambda n: (0, 0)),
            ],
            out_specs=pl.BlockSpec((1, H, W, Cout), lambda n: (n, 0, 0, 0)),
            scratch_shapes=[pltpu.VMEM((3, H + 2, Wpad, Cin), jnp.float32)],
        ),
        compiler_params=pltpu.CompilerParams(
            dimension_semantics=("parallel",)),
    )(x, w_hwio, s2, b2)


# ----------------------------------------------------------------------------------
# Kernel 2: depthwise 2x bilinear ConvTranspose2d (fixed weights) fused with skip add
# ----------------------------------------------------------------------------------
def upsample2x_add_kernel(y_ref, skip_ref, o_ref, pad_ref):
    """One batch element per grid step.

    y_ref   : (1, H, W, C)        proj output (to be upsampled 2x)
    skip_ref: (1, H, 2, W, 2C)    layers[i-1] in lane-packed layout
    o_ref   : (1, H, 2, W, 2C)    up(y) + skip in lane-packed layout
                                  [m, a, w, j] <-> (row 2m+a, col 2w + j//C, chan j%C)
    pad_ref : VMEM (H+2, W+2, C)  zero-bordered staging of y
    """
    H, W, C = y_ref.shape[1], y_ref.shape[2], y_ref.shape[3]

    # zero border each step (cheap); interior fully rewritten
    pad_ref[0:1, :, :] = jnp.zeros((1, W + 2, C), jnp.float32)
    pad_ref[H + 1:H + 2, :, :] = jnp.zeros((1, W + 2, C), jnp.float32)
    pad_ref[1:H + 1, 0:1, :] = jnp.zeros((H, 1, C), jnp.float32)
    pad_ref[1:H + 1, W + 1:W + 2, :] = jnp.zeros((H, 1, C), jnp.float32)
    pad_ref[1:H + 1, 1:W + 1, :] = y_ref[0]

    # separable transposed conv, stride 2, kernel [0.25, 0.75, 0.75, 0.25]
    pc = pad_ref[:, 1:W + 1, :]       # (H+2, W, C)  y[., n]
    plft = pad_ref[:, 0:W, :]         #              y[., n-1]
    prgt = pad_ref[:, 2:W + 2, :]     #              y[., n+1]
    ew = 0.75 * pc + 0.25 * plft      # even output columns (still on padded rows)
    ow = 0.75 * pc + 0.25 * prgt      # odd output columns

    ee = 0.75 * ew[1:H + 1] + 0.25 * ew[0:H]       # even row, even col   (H, W, C)
    oe = 0.75 * ew[1:H + 1] + 0.25 * ew[2:H + 2]   # odd  row, even col
    eo = 0.75 * ow[1:H + 1] + 0.25 * ow[0:H]       # even row, odd  col
    oo = 0.75 * ow[1:H + 1] + 0.25 * ow[2:H + 2]   # odd  row, odd  col

    # Lane-pack [even col | odd col] into 2C lanes via constant placement matmuls
    # (rides the MXU; avoids unaligned lane-offset stores).
    lane = lax.broadcasted_iota(jnp.int32, (C, 2 * C), 1)
    row = lax.broadcasted_iota(jnp.int32, (C, 2 * C), 0)
    p_even = (lane == row).astype(jnp.float32)
    p_odd = (lane == row + C).astype(jnp.float32)

    def pack(a, b):  # (H, W, C), (H, W, C) -> (H, W, 2C)
        a2 = a.reshape(H * W, C)
        b2 = b.reshape(H * W, C)
        packed = (jnp.dot(a2, p_even, preferred_element_type=jnp.float32) +
                  jnp.dot(b2, p_odd, preferred_element_type=jnp.float32))
        return packed.reshape(H, W, 2 * C)

    o_ref[0, :, 0, :, :] = pack(ee, eo) + skip_ref[0, :, 0, :, :]
    o_ref[0, :, 1, :, :] = pack(oe, oo) + skip_ref[0, :, 1, :, :]


@jax.jit
def upsample2x_add(y, skip):
    """up_2x(y) + skip.  y: (N, H, W, C), skip: (N, 2H, 2W, C) -> (N, 2H, 2W, C)."""
    N, H, W, C = y.shape
    assert skip.shape == (N, 2 * H, 2 * W, C)
    skip_packed = skip.reshape(N, H, 2, W, 2 * C)       # free row-major regrouping
    out_packed = pl.pallas_call(
        upsample2x_add_kernel,
        out_shape=jax.ShapeDtypeStruct((N, H, 2, W, 2 * C), jnp.float32),
        grid_spec=pltpu.PrefetchScalarGridSpec(
            num_scalar_prefetch=0,
            grid=(N,),
            in_specs=[
                pl.BlockSpec((1, H, W, C), lambda n: (n, 0, 0, 0)),
                pl.BlockSpec((1, H, 2, W, 2 * C), lambda n: (n, 0, 0, 0, 0)),
            ],
            out_specs=pl.BlockSpec((1, H, 2, W, 2 * C), lambda n: (n, 0, 0, 0, 0)),
            scratch_shapes=[pltpu.VMEM((H + 2, W + 2, C), jnp.float32)],
        ),
        compiler_params=pltpu.CompilerParams(
            dimension_semantics=("parallel",)),
    )(y, skip_packed)
    return out_packed.reshape(N, 2 * H, 2 * W, C)


# ----------------------------------------------------------------------------------
# Parameter construction mirroring DLAUp.__init__ / IDAUp.__init__ / DeformConv
# ----------------------------------------------------------------------------------
def make_deform_conv_params(key, cin, cout):
    k = jax.random.split(key, 6)
    w_oihw = jax.random.normal(k[0], (cout, cin, 3, 3), jnp.float32) / math.sqrt(9.0 * cin)
    w_hwio = jnp.transpose(w_oihw, (2, 3, 1, 0))              # (3, 3, Cin, Cout)
    conv_b = 0.1 * jax.random.normal(k[1], (cout,), jnp.float32)
    gamma = 1.0 + 0.1 * jax.random.normal(k[2], (cout,), jnp.float32)
    beta = 0.1 * jax.random.normal(k[3], (cout,), jnp.float32)
    mean = 0.1 * jax.random.normal(k[4], (cout,), jnp.float32)
    var = 1.0 + 0.1 * jax.random.uniform(k[5], (cout,), jnp.float32)
    scale = gamma / jnp.sqrt(var + 1e-5)                       # inference BN folding
    bias = (conv_b - mean) * scale + beta
    return {'w_hwio': w_hwio, 'conv_b': conv_b, 'bn_gamma': gamma, 'bn_beta': beta,
            'bn_mean': mean, 'bn_var': var, 'scale': scale, 'bias': bias}


def make_idaup_params(key, o, channels, up_f):
    params = {}
    keys = jax.random.split(key, 2 * len(channels))
    for i in range(1, len(channels)):
        c = channels[i]
        f = int(up_f[i])
        if f != 2:
            # TODO(synk): general up factors; DLAUp with power-of-two scales only uses f == 2.
            raise NotImplementedError("only 2x bilinear upsampling implemented")
        params[f'proj_{i}'] = make_deform_conv_params(keys[2 * i], c, o)
        params[f'node_{i}'] = make_deform_conv_params(keys[2 * i + 1], o, o)
    return params


def make_dlaup_params(key, startp, channels, scales, in_channels=None):
    channels = list(channels)
    in_channels = list(channels) if in_channels is None else list(in_channels)
    scales = np.array(scales, dtype=int)
    params = {'startp': startp}
    keys = jax.random.split(key, max(len(channels) - 1, 1))
    for i in range(len(channels) - 1):
        j = -i - 2
        params[f'ida_{i}'] = make_idaup_params(
            keys[i], channels[j], list(in_channels[j:]), list(scales[j:] // scales[j]))
        scales[j + 1:] = scales[j]
        in_channels[j + 1:] = [channels[j] for _ in channels[j + 1:]]
    return params


# ----------------------------------------------------------------------------------
# Forward drivers (mirror IDAUp.forward / DLAUp.forward), parameterised by op impls
# ----------------------------------------------------------------------------------
def idaup_forward(params, layers, startp, endp, conv_fn, up_add_fn):
    layers = list(layers)
    for i in range(startp + 1, endp):
        idx = i - startp
        projected = conv_fn(layers[i], params[f'proj_{idx}'])       # proj (DeformConv)
        layers[i] = up_add_fn(projected, layers[i - 1])             # up(...) + layers[i-1]
        layers[i] = conv_fn(layers[i], params[f'node_{idx}'])       # node (DeformConv)
    return layers


def dlaup_forward(params, layers, conv_fn, up_add_fn):
    layers = list(layers)
    startp = params['startp']
    out = [layers[-1]]
    for i in range(len(layers) - startp - 1):
        layers = idaup_forward(params[f'ida_{i}'], layers,
                               len(layers) - i - 2, len(layers), conv_fn, up_add_fn)
        out.insert(0, layers[-1])
    return out


# Pallas ops
def pallas_conv(x, p):
    return conv3x3_bn_relu(x, p['w_hwio'], p['scale'], p['bias'])


def pallas_up_add(y, skip):
    return upsample2x_add(y, skip)


# Pure-JAX reference ops
def ref_conv(x, p):
    dn = ('NHWC', 'HWIO', 'NHWC')
    y = lax.conv_general_dilated(x, p['w_hwio'], (1, 1), 'SAME', dimension_numbers=dn)
    y = y + p['conv_b']
    y = (y - p['bn_mean']) / jnp.sqrt(p['bn_var'] + 1e-5) * p['bn_gamma'] + p['bn_beta']
    return jnp.maximum(y, 0.0)


def ref_up_add(y, skip):
    C = y.shape[-1]
    k = jnp.array([0.25, 0.75, 0.75, 0.25], jnp.float32)   # fill_up_weights, f=2
    w = (k[:, None] * k[None, :]).reshape(4, 4, 1, 1)
    w = jnp.tile(w, (1, 1, 1, C))                           # depthwise HWIO (4,4,1,C)
    up = lax.conv_general_dilated(
        y, w, window_strides=(1, 1), padding=((2, 2), (2, 2)),
        lhs_dilation=(2, 2), dimension_numbers=('NHWC', 'HWIO', 'NHWC'),
        feature_group_count=C)
    return up + skip


# ----------------------------------------------------------------------------------
if __name__ == "__main__":
    key = jax.random.PRNGKey(0)
    N = 2
    startp = 0
    channels = [16, 32, 64]
    scales = [1, 2, 4]
    H0 = W0 = 16

    kp, kx_ = jax.random.split(key)
    params = make_dlaup_params(kp, startp, channels, scales)

    # Backbone feature pyramid in PyTorch NCHW; transposed to NHWC for the kernels (glue).
    xkeys = jax.random.split(kx_, len(channels))
    layers_nchw = []
    for lvl, c in enumerate(channels):
        h, w = H0 // scales[lvl], W0 // scales[lvl]
        layers_nchw.append(jax.random.normal(xkeys[lvl], (N, c, h, w), jnp.float32))
    layers_nhwc = [jnp.transpose(x, (0, 2, 3, 1)) for x in layers_nchw]

    outs = dlaup_forward(params, layers_nhwc, pallas_conv, pallas_up_add)
    outs = [jax.block_until_ready(o) for o in outs]

    refs = dlaup_forward(params, layers_nhwc, ref_conv, ref_up_add)

    assert len(outs) == len(refs)
    for o, r in zip(outs, refs):
        assert o.shape == r.shape, (o.shape, r.shape)
        err = float(jnp.max(jnp.abs(o - r)))
        assert jnp.allclose(o, r, atol=1e-3, rtol=1e-3), err

    print("KERNEL_OK")
</pallas_src>

<mosaic_0001>
module attributes {stable_mosaic.version = 11 : i64} {
  func.func @conv3x3_bn_relu_kernel(%arg0: i32, %arg1: memref<1x4x4x64xf32, #tpu.memory_space<vmem>>, %arg2: memref<3x3x64x32xf32, #tpu.memory_space<vmem>>, %arg3: memref<1x32xf32, #tpu.memory_space<vmem>>, %arg4: memref<1x32xf32, #tpu.memory_space<vmem>>, %arg5: memref<1x4x4x32xf32, #tpu.memory_space<vmem>>, %arg6: memref<3x6x8x64xf32, #tpu.memory_space<vmem>>) attributes {dimension_semantics = [#tpu.dimension_semantics<parallel>], iteration_bounds = array<i64: 2>, scalar_prefetch = 0 : i64, scratch_operands = 1 : i64, tpu.core_type = #tpu.core_type<tc>, window_params = [{transform_indices = @transform_0, window_bounds = array<i64: 1, 4, 4, 64>}, {pipeline_mode = #tpu.pipeline_mode<synchronous>, transform_indices = @transform_1, window_bounds = array<i64: 3, 3, 64, 32>}, {pipeline_mode = #tpu.pipeline_mode<synchronous>, transform_indices = @transform_2, window_bounds = array<i64: 1, 32>}, {pipeline_mode = #tpu.pipeline_mode<synchronous>, transform_indices = @transform_3, window_bounds = array<i64: 1, 32>}, {transform_indices = @transform_4, window_bounds = array<i64: 1, 4, 4, 32>}]} {
    %c0 = arith.constant 0 : index
    %c0_0 = arith.constant 0 : index
    %c0_1 = arith.constant 0 : index
    %c0_2 = arith.constant 0 : index
    %0 = vector.load %arg1[%c0, %c0_0, %c0_1, %c0_2] : memref<1x4x4x64xf32, #tpu.memory_space<vmem>>, vector<1x4x4x64xf32>
    %1 = vector.shape_cast %0 : vector<1x4x4x64xf32> to vector<4x4x64xf32>
    %cst = arith.constant 0.000000e+00 : f32
    %2 = vector.broadcast %cst : f32 to vector<3x1x8x64xf32>
    %c0_3 = arith.constant 0 : index
    %c0_4 = arith.constant 0 : index
    %c0_5 = arith.constant 0 : index
    %c0_6 = arith.constant 0 : index
    %3 = vector.load %arg6[%c0_3, %c0_4, %c0_5, %c0_6] : memref<3x6x8x64xf32, #tpu.memory_space<vmem>>, vector<3x1x8x64xf32>
    tpu.vector_store %arg6[%c0_3, %c0_4, %c0_5, %c0_6], %2 {strides = array<i32>} : memref<3x6x8x64xf32, #tpu.memory_space<vmem>>, vector<3x1x8x64xf32>,
    %cst_7 = arith.constant 0.000000e+00 : f32
    %4 = vector.broadcast %cst_7 : f32 to vector<3x1x8x64xf32>
    %c0_8 = arith.constant 0 : index
    %c5 = arith.constant 5 : index
    %c0_9 = arith.constant 0 : index
    %c0_10 = arith.constant 0 : index
    %5 = vector.load %arg6[%c0_8, %c5, %c0_9, %c0_10] : memref<3x6x8x64xf32, #tpu.memory_space<vmem>>, vector<3x1x8x64xf32>
    tpu.vector_store %arg6[%c0_8, %c5, %c0_9, %c0_10], %4 {strides = array<i32>} : memref<3x6x8x64xf32, #tpu.memory_space<vmem>>, vector<3x1x8x64xf32>,
    %cst_11 = arith.constant 0.000000e+00 : f32
    %6 = vector.broadcast %cst_11 : f32 to vector<4x1x64xf32>
    %c0_12 = arith.constant 0 : index
    %c1 = arith.constant 1 : index
    %c0_13 = arith.constant 0 : index
    %c0_14 = arith.constant 0 : index
    %7 = vector.load %arg6[%c0_12, %c1, %c0_13, %c0_14] : memref<3x6x8x64xf32, #tpu.memory_space<vmem>>, vector<1x4x1x64xf32>
    %8 = vector.shape_cast %7 : vector<1x4x1x64xf32> to vector<4x1x64xf32>
    %9 = vector.shape_cast %6 : vector<4x1x64xf32> to vector<1x4x1x64xf32>
    tpu.vector_store %arg6[%c0_12, %c1, %c0_13, %c0_14], %9 {strides = array<i32>} : memref<3x6x8x64xf32, #tpu.memory_space<vmem>>, vector<1x4x1x64xf32>,
    %cst_15 = arith.constant 0.000000e+00 : f32
    %10 = vector.broadcast %cst_15 : f32 to vector<4x1x64xf32>
    %c2 = arith.constant 2 : index
    %c1_16 = arith.constant 1 : index
    %c3 = arith.constant 3 : index
    %c0_17 = arith.constant 0 : index
    %11 = vector.load %arg6[%c2, %c1_16, %c3, %c0_17] : memref<3x6x8x64xf32, #tpu.memory_space<vmem>>, vector<1x4x1x64xf32>
    %12 = vector.shape_cast %11 : vector<1x4x1x64xf32> to vector<4x1x64xf32>
    %13 = vector.shape_cast %10 : vector<4x1x64xf32> to vector<1x4x1x64xf32>
    tpu.vector_store %arg6[%c2, %c1_16, %c3, %c0_17], %13 {strides = array<i32>} : memref<3x6x8x64xf32, #tpu.memory_space<vmem>>, vector<1x4x1x64xf32>,
    %c0_18 = arith.constant 0 : index
    %c1_19 = arith.constant 1 : index
    %c1_20 = arith.constant 1 : index
    %c0_21 = arith.constant 0 : index
    %14 = vector.load %arg6[%c0_18, %c1_19, %c1_20, %c0_21] : memref<3x6x8x64xf32, #tpu.memory_space<vmem>>, vector<1x4x4x64xf32>
    %15 = vector.shape_cast %14 : vector<1x4x4x64xf32> to vector<4x4x64xf32>
    %16 = vector.shape_cast %1 : vector<4x4x64xf32> to vector<1x4x4x64xf32>
    tpu.vector_store %arg6[%c0_18, %c1_19, %c1_20, %c0_21], %16 {strides = array<i32>} : memref<3x6x8x64xf32, #tpu.memory_space<vmem>>, vector<1x4x4x64xf32>,
    %c1_22 = arith.constant 1 : index
    %c1_23 = arith.constant 1 : index
    %c0_24 = arith.constant 0 : index
    %c0_25 = arith.constant 0 : index
    %17 = vector.load %arg6[%c1_22, %c1_23, %c0_24, %c0_25] : memref<3x6x8x64xf32, #tpu.memory_space<vmem>>, vector<1x4x4x64xf32>
    %18 = vector.shape_cast %17 : vector<1x4x4x64xf32> to vector<4x4x64xf32>
    %19 = vector.shape_cast %1 : vector<4x4x64xf32> to vector<1x4x4x64xf32>
    tpu.vector_store %arg6[%c1_22, %c1_23, %c0_24, %c0_25], %19 {strides = array<i32>} : memref<3x6x8x64xf32, #tpu.memory_space<vmem>>, vector<1x4x4x64xf32>,
    %20 = vector.extract_strided_slice %1 {offsets = [0, 1, 0], sizes = [4, 3, 64], strides = [1, 1, 1]} : vector<4x4x64xf32> to vector<4x3x64xf32>
    %c2_26 = arith.constant 2 : index
    %c1_27 = arith.constant 1 : index
    %c0_28 = arith.constant 0 : index
    %c0_29 = arith.constant 0 : index
    %21 = vector.load %arg6[%c2_26, %c1_27, %c0_28, %c0_29] : memref<3x6x8x64xf32, #tpu.memory_space<vmem>>, vector<1x4x3x64xf32>
    %22 = vector.shape_cast %21 : vector<1x4x3x64xf32> to vector<4x3x64xf32>
    %23 = vector.shape_cast %20 : vector<4x3x64xf32> to vector<1x4x3x64xf32>
    tpu.vector_store %arg6[%c2_26, %c1_27, %c0_28, %c0_29], %23 {strides = array<i32>} : memref<3x6x8x64xf32, #tpu.memory_space<vmem>>, vector<1x4x3x64xf32>,
    %cst_30 = arith.constant 0.000000e+00 : f32
    %24 = vector.broadcast %cst_30 : f32 to vector<32x32xf32>
    %c0_31 = arith.constant 0 : index
    %c0_32 = arith.constant 0 : index
    %c0_33 = arith.constant 0 : index
    %c0_34 = arith.constant 0 : index
    %25 = vector.load %arg6[%c0_31, %c0_32, %c0_33, %c0_34] : memref<3x6x8x64xf32, #tpu.memory_space<vmem>>, vector<1x4x8x64xf32>
    %26 = vector.shape_cast %25 : vector<1x4x8x64xf32> to vector<4x8x64xf32>
    %27 = vector.shape_cast %26 : vector<4x8x64xf32> to vector<32x64xf32>
    %c0_35 = arith.constant 0 : index
    %c0_36 = arith.constant 0 : index
    %c0_37 = arith.constant 0 : index
    %c0_38 = arith.constant 0 : index
    %28 = vector.load %arg2[%c0_35, %c0_36, %c0_37, %c0_38] : memref<3x3x64x32xf32, #tpu.memory_space<vmem>>, vector<1x1x64x32xf32>
    %29 = vector.shape_cast %28 : vector<1x1x64x32xf32> to vector<64x32xf32>
    %cst_39 = arith.constant dense<0.000000e+00> : vector<32x32xf32>
    %30 = tpu.matmul %27, %29, %cst_39 {dimension_numbers = #tpu.dot_dimension_numbers<[1], [0], [0], [1], [0, 0, 1, 1], [], []>} : vector<32x64xf32>, vector<64x32xf32>, vector<32x32xf32> -> vector<32x32xf32>
    %31 = arith.addf %24, %30 : vector<32x32xf32>
    %c1_40 = arith.constant 1 : index
    %c0_41 = arith.constant 0 : index
    %c0_42 = arith.constant 0 : index
    %c0_43 = arith.constant 0 : index
    %32 = vector.load %arg6[%c1_40, %c0_41, %c0_42, %c0_43] : memref<3x6x8x64xf32, #tpu.memory_space<vmem>>, vector<1x4x8x64xf32>
    %33 = vector.shape_cast %32 : vector<1x4x8x64xf32> to vector<4x8x64xf32>
    %34 = vector.shape_cast %33 : vector<4x8x64xf32> to vector<32x64xf32>
    %c0_44 = arith.constant 0 : index
    %c1_45 = arith.constant 1 : index
    %c0_46 = arith.constant 0 : index
    %c0_47 = arith.constant 0 : index
    %35 = vector.load %arg2[%c0_44, %c1_45, %c0_46, %c0_47] : memref<3x3x64x32xf32, #tpu.memory_space<vmem>>, vector<1x1x64x32xf32>
    %36 = vector.shape_cast %35 : vector<1x1x64x32xf32> to vector<64x32xf32>
    %cst_48 = arith.constant dense<0.000000e+00> : vector<32x32xf32>
    %37 = tpu.matmul %34, %36, %cst_48 {dimension_numbers = #tpu.dot_dimension_numbers<[1], [0], [0], [1], [0, 0, 1, 1], [], []>} : vector<32x64xf32>, vector<64x32xf32>, vector<32x32xf32> -> vector<32x32xf32>
    %38 = arith.addf %31, %37 : vector<32x32xf32>
    %c2_49 = arith.constant 2 : index
    %c0_50 = arith.constant 0 : index
    %c0_51 = arith.constant 0 : index
    %c0_52 = arith.constant 0 : index
    %39 = vector.load %arg6[%c2_49, %c0_50, %c0_51, %c0_52] : memref<3x6x8x64xf32, #tpu.memory_space<vmem>>, vector<1x4x8x64xf32>
    %40 = vector.shape_cast %39 : vector<1x4x8x64xf32> to vector<4x8x64xf32>
    %41 = vector.shape_cast %40 : vector<4x8x64xf32> to vector<32x64xf32>
    %c0_53 = arith.constant 0 : index
    %c2_54 = arith.constant 2 : index
    %c0_55 = arith.constant 0 : index
    %c0_56 = arith.constant 0 : index
    %42 = vector.load %arg2[%c0_53, %c2_54, %c0_55, %c0_56] : memref<3x3x64x32xf32, #tpu.memory_space<vmem>>, vector<1x1x64x32xf32>
    %43 = vector.shape_cast %42 : vector<1x1x64x32xf32> to vector<64x32xf32>
    %cst_57 = arith.constant dense<0.000000e+00> : vector<32x32xf32>
    %44 = tpu.matmul %41, %43, %cst_57 {dimension_numbers = #tpu.dot_dimension_numbers<[1], [0], [0], [1], [0, 0, 1, 1], [], []>} : vector<32x64xf32>, vector<64x32xf32>, vector<32x32xf32> -> vector<32x32xf32>
    %45 = arith.addf %38, %44 : vector<32x32xf32>
    %c0_58 = arith.constant 0 : index
    %c1_59 = arith.constant 1 : index
    %c0_60 = arith.constant 0 : index
    %c0_61 = arith.constant 0 : index
    %46 = vector.load %arg6[%c0_58, %c1_59, %c0_60, %c0_61] : memref<3x6x8x64xf32, #tpu.memory_space<vmem>>, vector<1x4x8x64xf32>
    %47 = vector.shape_cast %46 : vector<1x4x8x64xf32> to vector<4x8x64xf32>
    %48 = vector.shape_cast %47 : vector<4x8x64xf32> to vector<32x64xf32>
    %c1_62 = arith.constant 1 : index
    %c0_63 = arith.constant 0 : index
    %c0_64 = arith.constant 0 : index
    %c0_65 = arith.constant 0 : index
    %49 = vector.load %arg2[%c1_62, %c0_63, %c0_64, %c0_65] : memref<3x3x64x32xf32, #tpu.memory_space<vmem>>, vector<1x1x64x32xf32>
    %50 = vector.shape_cast %49 : vector<1x1x64x32xf32> to vector<64x32xf32>
    %cst_66 = arith.constant dense<0.000000e+00> : vector<32x32xf32>
    %51 = tpu.matmul %48, %50, %cst_66 {dimension_numbers = #tpu.dot_dimension_numbers<[1], [0], [0], [1], [0, 0, 1, 1], [], []>} : vector<32x64xf32>, vector<64x32xf32>, vector<32x32xf32> -> vector<32x32xf32>
    %52 = arith.addf %45, %51 : vector<32x32xf32>
    %c1_67 = arith.constant 1 : index
    %c1_68 = arith.constant 1 : index
    %c0_69 = arith.constant 0 : index
    %c0_70 = arith.constant 0 : index
    %53 = vector.load %arg6[%c1_67, %c1_68, %c0_69, %c0_70] : memref<3x6x8x64xf32, #tpu.memory_space<vmem>>, vector<1x4x8x64xf32>
    %54 = vector.shape_cast %53 : vector<1x4x8x64xf32> to vector<4x8x64xf32>
    %55 = vector.shape_cast %54 : vector<4x8x64xf32> to vector<32x64xf32>
    %c1_71 = arith.constant 1 : index
    %c1_72 = arith.constant 1 : index
    %c0_73 = arith.constant 0 : index
    %c0_74 = arith.constant 0 : index
    %56 = vector.load %arg2[%c1_71, %c1_72, %c0_73, %c0_74] : memref<3x3x64x32xf32, #tpu.memory_space<vmem>>, vector<1x1x64x32xf32>
    %57 = vector.shape_cast %56 : vector<1x1x64x32xf32> to vector<64x32xf32>
    %cst_75 = arith.constant dense<0.000000e+00> : vector<32x32xf32>
    %58 = tpu.matmul %55, %57, %cst_75 {dimension_numbers = #tpu.dot_dimension_numbers<[1], [0], [0], [1], [0, 0, 1, 1], [], []>} : vector<32x64xf32>, vector<64x32xf32>, vector<32x32xf32> -> vector<32x32xf32>
    %59 = arith.addf %52, %58 : vector<32x32xf32>
    %c2_76 = arith.constant 2 : index
    %c1_77 = arith.constant 1 : index
    %c0_78 = arith.constant 0 : index
    %c0_79 = arith.constant 0 : index
    %60 = vector.load %arg6[%c2_76, %c1_77, %c0_78, %c0_79] : memref<3x6x8x64xf32, #tpu.memory_space<vmem>>, vector<1x4x8x64xf32>
    %61 = vector.shape_cast %60 : vector<1x4x8x64xf32> to vector<4x8x64xf32>
    %62 = vector.shape_cast %61 : vector<4x8x64xf32> to vector<32x64xf32>
    %c1_80 = arith.constant 1 : index
    %c2_81 = arith.constant 2 : index
    %c0_82 = arith.constant 0 : index
    %c0_83 = arith.constant 0 : index
    %63 = vector.load %arg2[%c1_80, %c2_81, %c0_82, %c0_83] : memref<3x3x64x32xf32, #tpu.memory_space<vmem>>, vector<1x1x64x32xf32>
    %64 = vector.shape_cast %63 : vector<1x1x64x32xf32> to vector<64x32xf32>
    %cst_84 = arith.constant dense<0.000000e+00> : vector<32x32xf32>
    %65 = tpu.matmul %62, %64, %cst_84 {dimension_numbers = #tpu.dot_dimension_numbers<[1], [0], [0], [1], [0, 0, 1, 1], [], []>} : vector<32x64xf32>, vector<64x32xf32>, vector<32x32xf32> -> vector<32x32xf32>
    %66 = arith.addf %59, %65 : vector<32x32xf32>
    %c0_85 = arith.constant 0 : index
    %c2_86 = arith.constant 2 : index
    %c0_87 = arith.constant 0 : index
    %c0_88 = arith.constant 0 : index
    %67 = vector.load %arg6[%c0_85, %c2_86, %c0_87, %c0_88] : memref<3x6x8x64xf32, #tpu.memory_space<vmem>>, vector<1x4x8x64xf32>
    %68 = vector.shape_cast %67 : vector<1x4x8x64xf32> to vector<4x8x64xf32>
    %69 = vector.shape_cast %68 : vector<4x8x64xf32> to vector<32x64xf32>
    %c2_89 = arith.constant 2 : index
    %c0_90 = arith.constant 0 : index
    %c0_91 = arith.constant 0 : index
    %c0_92 = arith.constant 0 : index
    %70 = vector.load %arg2[%c2_89, %c0_90, %c0_91, %c0_92] : memref<3x3x64x32xf32, #tpu.memory_space<vmem>>, vector<1x1x64x32xf32>
    %71 = vector.shape_cast %70 : vector<1x1x64x32xf32> to vector<64x32xf32>
    %cst_93 = arith.constant dense<0.000000e+00> : vector<32x32xf32>
    %72 = tpu.matmul %69, %71, %cst_93 {dimension_numbers = #tpu.dot_dimension_numbers<[1], [0], [0], [1], [0, 0, 1, 1], [], []>} : vector<32x64xf32>, vector<64x32xf32>, vector<32x32xf32> -> vector<32x32xf32>
    %73 = arith.addf %66, %72 : vector<32x32xf32>
    %c1_94 = arith.constant 1 : index
    %c2_95 = arith.constant 2 : index
    %c0_96 = arith.constant 0 : index
    %c0_97 = arith.constant 0 : index
    %74 = vector.load %arg6[%c1_94, %c2_95, %c0_96, %c0_97] : memref<3x6x8x64xf32, #tpu.memory_space<vmem>>, vector<1x4x8x64xf32>
    %75 = vector.shape_cast %74 : vector<1x4x8x64xf32> to vector<4x8x64xf32>
    %76 = vector.shape_cast %75 : vector<4x8x64xf32> to vector<32x64xf32>
    %c2_98 = arith.constant 2 : index
    %c1_99 = arith.constant 1 : index
    %c0_100 = arith.constant 0 : index
    %c0_101 = arith.constant 0 : index
    %77 = vector.load %arg2[%c2_98, %c1_99, %c0_100, %c0_101] : memref<3x3x64x32xf32, #tpu.memory_space<vmem>>, vector<1x1x64x32xf32>
    %78 = vector.shape_cast %77 : vector<1x1x64x32xf32> to vector<64x32xf32>
    %cst_102 = arith.constant dense<0.000000e+00> : vector<32x32xf32>
    %79 = tpu.matmul %76, %78, %cst_102 {dimension_numbers = #tpu.dot_dimension_numbers<[1], [0], [0], [1], [0, 0, 1, 1], [], []>} : vector<32x64xf32>, vector<64x32xf32>, vector<32x32xf32> -> vector<32x32xf32>
    %80 = arith.addf %73, %79 : vector<32x32xf32>
    %c2_103 = arith.constant 2 : index
    %c2_104 = arith.constant 2 : index
    %c0_105 = arith.constant 0 : index
    %c0_106 = arith.constant 0 : index
    %81 = vector.load %arg6[%c2_103, %c2_104, %c0_105, %c0_106] : memref<3x6x8x64xf32, #tpu.memory_space<vmem>>, vector<1x4x8x64xf32>
    %82 = vector.shape_cast %81 : vector<1x4x8x64xf32> to vector<4x8x64xf32>
    %83 = vector.shape_cast %82 : vector<4x8x64xf32> to vector<32x64xf32>
    %c2_107 = arith.constant 2 : index
    %c2_108 = arith.constant 2 : index
    %c0_109 = arith.constant 0 : index
    %c0_110 = arith.constant 0 : index
    %84 = vector.load %arg2[%c2_107, %c2_108, %c0_109, %c0_110] : memref<3x3x64x32xf32, #tpu.memory_space<vmem>>, vector<1x1x64x32xf32>
    %85 = vector.shape_cast %84 : vector<1x1x64x32xf32> to vector<64x32xf32>
    %cst_111 = arith.constant dense<0.000000e+00> : vector<32x32xf32>
    %86 = tpu.matmul %83, %85, %cst_111 {dimension_numbers = #tpu.dot_dimension_numbers<[1], [0], [0], [1], [0, 0, 1, 1], [], []>} : vector<32x64xf32>, vector<64x32xf32>, vector<32x32xf32> -> vector<32x32xf32>
    %87 = arith.addf %80, %86 : vector<32x32xf32>
    %c0_112 = arith.constant 0 : index
    %c0_113 = arith.constant 0 : index
    %88 = vector.load %arg3[%c0_112, %c0_113] : memref<1x32xf32, #tpu.memory_space<vmem>>, vector<1x32xf32>
    %89 = vector.broadcast %88 : vector<1x32xf32> to vector<32x32xf32>
    %90 = arith.mulf %87, %89 : vector<32x32xf32>
    %c0_114 = arith.constant 0 : index
    %c0_115 = arith.constant 0 : index
    %91 = vector.load %arg4[%c0_114, %c0_115] : memref<1x32xf32, #tpu.memory_space<vmem>>, vector<1x32xf32>
    %92 = vector.broadcast %91 : vector<1x32xf32> to vector<32x32xf32>
    %93 = arith.addf %90, %92 : vector<32x32xf32>
    %cst_116 = arith.constant 0.000000e+00 : f32
    %94 = vector.broadcast %cst_116 : f32 to vector<32x32xf32>
    %95 = arith.maximumf %93, %94 : vector<32x32xf32>
    %96 = vector.shape_cast %95 : vector<32x32xf32> to vector<4x8x32xf32>
    %97 = vector.extract_strided_slice %96 {offsets = [0, 0, 0], sizes = [4, 4, 32], strides = [1, 1, 1]} : vector<4x8x32xf32> to vector<4x4x32xf32>
    %98 = vector.shape_cast %97 : vector<4x4x32xf32> to vector<1x4x4x32xf32>
    %c0_117 = arith.constant 0 : index
    %c0_118 = arith.constant 0 : index
    %c0_119 = arith.constant 0 : index
    %c0_120 = arith.constant 0 : index
    %99 = vector.load %arg5[%c0_117, %c0_118, %c0_119, %c0_120] : memref<1x4x4x32xf32, #tpu.memory_space<vmem>>, vector<1x4x4x32xf32>
    tpu.vector_store %arg5[%c0_117, %c0_118, %c0_119, %c0_120], %98 {strides = array<i32>} : memref<1x4x4x32xf32, #tpu.memory_space<vmem>>, vector<1x4x4x32xf32>,
    return
  }
  func.func @transform_0(%arg0: i32) -> (i32, i32, i32, i32) {
    %c0_i32 = arith.constant 0 : i32
    %c0_i32_0 = arith.constant 0 : i32
    %c0_i32_1 = arith.constant 0 : i32
    %c0_i32_2 = arith.constant 0 : i32
    return %arg0, %c0_i32, %c0_i32_0, %c0_i32_1 : i32, i32, i32, i32
  }
  func.func @transform_1(%arg0: i32) -> (i32, i32, i32, i32) {
    %c0_i32 = arith.constant 0 : i32
    %c0_i32_0 = arith.constant 0 : i32
    %c0_i32_1 = arith.constant 0 : i32
    %c0_i32_2 = arith.constant 0 : i32
    %c0_i32_3 = arith.constant 0 : i32
    return %c0_i32, %c0_i32_0, %c0_i32_1, %c0_i32_2 : i32, i32, i32, i32
  }
  func.func @transform_2(%arg0: i32) -> (i32, i32) {
    %c0_i32 = arith.constant 0 : i32
    %c0_i32_0 = arith.constant 0 : i32
    %c0_i32_1 = arith.constant 0 : i32
    return %c0_i32, %c0_i32_0 : i32, i32
  }
  func.func @transform_3(%arg0: i32) -> (i32, i32) {
    %c0_i32 = arith.constant 0 : i32
    %c0_i32_0 = arith.constant 0 : i32
    %c0_i32_1 = arith.constant 0 : i32
    return %c0_i32, %c0_i32_0 : i32, i32
  }
  func.func @transform_4(%arg0: i32) -> (i32, i32, i32, i32) {
    %c0_i32 = arith.constant 0 : i32
    %c0_i32_0 = arith.constant 0 : i32
    %c0_i32_1 = arith.constant 0 : i32
    %c0_i32_2 = arith.constant 0 : i32
    return %arg0, %c0_i32, %c0_i32_0, %c0_i32_1 : i32, i32, i32, i32
  }
}

</mosaic_0001>

<bundles_post_ra>
// kernel: conv3x3_bn_relu.1
= control target key start
LH: loop header
LB: loop body
LE: loop exit
PB: predicated region body
PF: predicated region fallthrough
CT: control target
= control target key end

     0   :  { %9 = vsyncpa [#allocation4], 0  ;;  %s1563_s0 = inlined_call_operand.vmem [shape: f32[2,4,4,64], index: 0, kind: input, shape index: {}]   ;;  %s1564_s1 = inlined_call_operand.vmem [shape: f32[3,3,64,32], index: 1, kind: input, shape index: {}]   ;;  %s1565_s2 = inlined_call_operand.vmem [shape: f32[1,32], index: 2, kind: input, shape index: {}]   ;;  %s1566_s3 = inlined_call_operand.vmem [shape: f32[1,32], index: 3, kind: input, shape index: {}]   ;;  %s1567_s4 = inlined_call_operand.hbm [shape: f32[2,4,4,32], index: 4, kind: output, shape index: {}]  }
   0x1   :  { %11 = vsyncpa [#allocation4 + $0x1], 0  ;;  %s1121_s15 = smov 0   ;;  %s1123_s16 = smov 0  }
   0x2   :  { %s1125_s17 = smov 0   ;;  %s1127_s18 = smov 0  }
   0x3 LB: > { %s1142_s19 = sadd.s32 4294967295, %s1091_s18   ;;  %s855_s20 = sadd.s32 4294967294, %s1091_s18   ;;  %s1091_s18 = sphi %s1127_s18, %s1573_s18   ;;  %s1087_s17 = sphi %s1125_s17, %s1572_s17   ;;  %s1083_s16 = sphi %s1123_s16, %s1571_s16   ;;  %s1079_s15 = sphi %s1121_s15, %s1570_s15  }
   0x4   : > { %s1146_s21 = sadd.s32 1, %s1091_s18   ;;  %s113_s22 = sadd.s32 1, %s1087_s17 }
   0x5   : > { %s110_s23 = ssub.s32 %s1091_s18, %s1146_s21  ;;  %p123_p0 = scmp.ne.s32.totalorder %s1087_s17, %s1083_s16 }
   0x6   : > { %p111_p1 = scmp.eq.s32.totalorder %s110_s23, 0  ;;  %p124_p2 = scmp.eq.s32.totalorder %s1142_s19, 1 }
   0x7   : > { %p129_p3 = scmp.ne.s32.totalorder %s1083_s16, %s1079_s15  ;;  %p130_p4 = scmp.eq.s32.totalorder %s855_s20, 1 }
   0x8   : > { %s1157_s24 = scalar_select %p111_p1, %s1087_s17, %s113_s22  }
   0x9   : > { %p1159_p5 = por %p124_p2, %p123_p0  ;;  %p1163_p6 = por %p130_p4, %p129_p3 }
   0xa   : > { %p858_p7 = scmp.ge.s32.totalorder %s1091_s18, 1  ;;  %p165_p8 = scmp.lt.s32.totalorder %s1091_s18, 3 }
   0xc   : > { %p166_p9 = pnand %p858_p7, %p165_p8 }
   0xd   : > { %p191_p10 = scmp.lt.s32.totalorder (!%p166_p9), %s1142_s19, 1  ;;  %s188_s28 = sand.u32 (!%p166_p9), 1, %s1083_s16  }
   0xe   : > { %169 = sbr.rel (%p166_p9) target bundleno = 251 (0xfb), region = 36  ;;  %s859_s5 = sshll.u32 (!%p166_p9), %s188_s28, 4 }
   0xf   : > { %s968_s7 = sshll.u32 (!%p166_p9), %s1142_s19, 4  ;;  %s1049_s23 = scalar_lea.hbm (!%p166_p9), %s1567_s4, 32 }
  0x10   : > { %s789_s10 = scalar_lea.hbm (!%p166_p9), %s1567_s4, %s968_s7 }
  0x11   : > { %s792_s12 = sshll.u32 (!%p166_p9), %s789_s10, 4  ;;  %s793_s12 = int_to_ptr.hbm [resolvable:$true] %s792_s12 }
  0x12   : > { %s1043_s13 = sshra.s32 (!%p166_p9), %s793_s12, 4  ;;  %s1044_s13 = int_to_ptr.hbm [resolvable:$true] %s1043_s13 }
  0x13   : > { %v869_v0 = vld [vmem:[%s1564_s1 + $0x78] sm:$0xff]  ;;  %v868_v1 = vld [vmem:[%s1564_s1 + $0x70] sm:$0xff]  ;;  %vm200_vm0 = vcmask 523264   ;;  %v867_v3 = vld [vmem:[%s1564_s1 + $0x68] sm:$0xff]  ;;  %s192_s11 = scalar_select %p191_p10, %s1142_s19, 1  ;;  %v1093_v5 = vmov 0.0  }
  0x14   : > { %969 = vmatpush.msra.mxu1 %v869_v0  ;;  %280 = vmatpush.msra.mxu0 %v869_v0  ;;  %v885_v2 = vld [vmem:[%s1564_s1 + $0xb8] sm:$0xff]  ;;  %v884_v4 = vld [vmem:[%s1564_s1 + $0xb0] sm:$0xff]  ;;  %202 = vst.msk [vmem:[#allocation2 + $0x30] sm:$0xff] %vm200_vm0, %v1093_v5  ;;  %v883_v6 = vld [vmem:[%s1564_s1 + $0xa8] sm:$0xff]  ;;  %vm219_vm1 = vcmask 519168   ;;  %vm209_vm2 = vcmask 516096   ;;  %p1050_p0 = scmp.lt.s32.totalorder %s1044_s13, %s1567_s4 }
  0x15   : > { %376 = vmatpush.msra.mxu2 %v885_v2  ;;  %201 = vst.msk [vmem:[#allocation2] sm:$0xff] %vm200_vm0, %v1093_v5  ;;  %v866_v7 = vld [vmem:[%s1564_s1 + $0x60] sm:$0xff]  ;;  %v897_v8 = vld [vmem:[%s1564_s1 + $0xf8] sm:$0xff]  ;;  %s967_s27 = sshll.u32 %s192_s11, 4  ;;  %v896_v10 = vld [vmem:[%s1564_s1 + $0xf0] sm:$0xff]  ;;  %vm229_vm3 = vcmask 519169  }
  0x16   : > { %970 = vmatpush.msra.mxu1 %v868_v1  ;;  %281 = vmatpush.msra.mxu0 %v868_v1  ;;  %203 = vst.msk [vmem:[#allocation2 + $0x60] sm:$0xff] %vm200_vm0, %v1093_v5  ;;  %v882_v9 = vld [vmem:[%s1564_s1 + $0xa0] sm:$0xff]  ;;  %s1207_s6 = scalar_lea.vmem %s1563_s0, %s967_s27  ;;  %v865_v11 = vld [vmem:[%s1564_s1 + $0x58] sm:$0xff]  ;;  %v895_v14 = vld [vmem:[%s1564_s1 + $0xe8] sm:$0xff]  ;;  %vm772_vm4 = vcmask 257024   ;;  %s778_s19 = scalar_lea.sflag [#allocation4], %s188_s28 }
  0x17   : > { %377 = vmatpush.msra.mxu2 %v884_v4  ;;  %205 = vst.msk [vmem:[#allocation2 + $0x28] sm:$0xff] %vm200_vm0, %v1093_v5  ;;  %434 = vmatpush.msra.mxu3 %v897_v8  ;;  %v1218_v12 = vld [vmem:[%s1207_s6 + $0x4] sm:$0xf]  ;;  %v881_v13 = vld [vmem:[%s1564_s1 + $0x98] sm:$0xff]  ;;  %v864_v15 = vld [vmem:[%s1564_s1 + $0x50] sm:$0xff]  ;;  %s1045_s14 = scalar_lea.hbm %s1044_s13, 16 }
  0x18   : > { %971 = vmatpush.msra.mxu1 %v867_v3  ;;  %282 = vmatpush.msra.mxu0 %v867_v3  ;;  %206 = vst.msk [vmem:[#allocation2 + $0x58] sm:$0xff] %vm200_vm0, %v1093_v5  ;;  %v880_v16 = vld [vmem:[%s1564_s1 + $0x90] sm:$0xff]  ;;  %v894_v17 = vld [vmem:[%s1564_s1 + $0xe0] sm:$0xff]  ;;  %v1244_v18 = vld [vmem:[%s1207_s6 + $0x8] sm:$0xf]  ;;  %p1046_p11 = scmp.ne.s32.totalorder %s1044_s13, %s1045_s14  ;;  %p1051_p1 = scmp.lt.s32.totalorder %s1049_s23, %s1045_s14 }
  0x19   : > { %378 = vmatpush.msra.mxu2 %v883_v6  ;;  %226 = vst.msk [vmem:[#allocation2 + $0x40] sm:$0xf] %vm219_vm1, %v1218_v12  ;;  %435 = vmatpush.msra.mxu3 %v896_v10  ;;  %v863_v19 = vld [vmem:[%s1564_s1 + $0x48] sm:$0xff]  ;;  %v893_v21 = vld [vmem:[%s1564_s1 + $0xd8] sm:$0xff]  ;;  %v862_v22 = vld [vmem:[%s1564_s1 + $0x40] sm:$0xff] }
  0x1a   : > { %972 = vmatpush.msra.mxu1 %v866_v7  ;;  %283 = vmatpush.msra.mxu0 %v866_v7  ;;  %221 = vst.msk [vmem:[#allocation2 + $0x11] sm:$0xf] %vm219_vm1, %v1218_v12  ;;  %v879_v20 = vld [vmem:[%s1564_s1 + $0x88] sm:$0xff]  ;;  %v196_v24 = vld [vmem:[%s1207_s6] sm:$0xf]  ;;  %v245_v26 = vld [vmem:[%s1564_s1 + $0x38] sm:$0xff]  ;;  %p1047_p12 = pnand %p1046_p11, %p1159_p5  ;;  %p1052_p2 = por %p1051_p1, %p1050_p0 }
  0x1b   : > { %379 = vmatpush.msra.mxu2 %v882_v9  ;;  %207 = vst.msk [vmem:[#allocation2 + $0x88] sm:$0xff] %vm200_vm0, %v1093_v5  ;;  %436 = vmatpush.msra.mxu3 %v895_v14  ;;  %v247_v23 = vld [vmem:[#allocation2 + $0x30] sm:$0xff]  ;;  %v878_v27 = vld [vmem:[%s1564_s1 + $0x80] sm:$0xff]  ;;  %v909_v28 = vld [vmem:[%s1564_s1 + $0x138] sm:$0xff] }
  0x1c   : > { %973 = vmatpush.msra.mxu1 %v865_v11  ;;  %284 = vmatpush.msra.mxu0 %v865_v11  ;;  %227 = vst.msk [vmem:[#allocation2 + $0x48] sm:$0xf] %vm219_vm1, %v1244_v18  ;;  %v244_v30 = vld [vmem:[%s1564_s1 + $0x30] sm:$0xff]  ;;  %v933_v31 = vld [vmem:[%s1564_s1 + $0x1b8] sm:$0xff]  ;;  %v243_v34 = vld [vmem:[%s1564_s1 + $0x28] sm:$0xff]  ;;  %p1048_p13 = pneg %p1047_p12 }
  0x1d   : > { %380 = vmatpush.msra.mxu2 %v881_v13  ;;  %222 = vst.msk [vmem:[#allocation2 + $0x19] sm:$0xf] %vm219_vm1, %v1244_v18  ;;  %437 = vmatpush.msra.mxu3 %v894_v17  ;;  %v343_v29 = vld [vmem:[#allocation2 + $0x60] sm:$0xff]  ;;  %v892_v32 = vld [vmem:[%s1564_s1 + $0xd0] sm:$0xff]  ;;  %v891_v36 = vld [vmem:[%s1564_s1 + $0xc8] sm:$0xff] }
  0x1e   : > { %974 = vmatpush.msra.mxu1 %v864_v15  ;;  %285 = vmatpush.msra.mxu0 %v864_v15  ;;  %210 = vst.msk [vmem:[#allocation2 + $0x8] sm:$0x1] %vm209_vm2, %v1093_v5  ;;  %v908_v33 = vld [vmem:[%s1564_s1 + $0x130] sm:$0xff]  ;;  %v907_v37 = vld [vmem:[%s1564_s1 + $0x128] sm:$0xff]  ;;  %v242_v38 = vld [vmem:[%s1564_s1 + $0x20] sm:$0xff]  ;;  %p1053_p3 = pnand %p1052_p2, %p1048_p13 }
  0x1f   : > { %381 = vmatpush.msra.mxu2 %v880_v16  ;;  %211 = vst.msk [vmem:[#allocation2 + $0x10] sm:$0x1] %vm209_vm2, %v1093_v5  ;;  %438 = vmatpush.msra.mxu3 %v893_v21  ;;  %v932_v35 = vld [vmem:[%s1564_s1 + $0x1b0] sm:$0xff]  ;;  %v931_v39 = vld [vmem:[%s1564_s1 + $0x1a8] sm:$0xff]  ;;  %v890_v41 = vld [vmem:[%s1564_s1 + $0xc0] sm:$0xff] }
  0x20   : > { %975 = vmatpush.msra.mxu1 %v863_v19  ;;  %286 = vmatpush.msra.mxu0 %v863_v19  ;;  %v1267_v25 = vld [vmem:[#allocation2 + $0x40] sm:$0xff]  ;;  %225 = vst.msk [vmem:[#allocation2 + $0x38] sm:$0xf] %vm219_vm1, %v196_v24  ;;  %v241_v42 = vld [vmem:[%s1564_s1 + $0x18] sm:$0xff]  ;;  %v240_v46 = vld [vmem:[%s1564_s1 + $0x10] sm:$0xff] }
  0x21   : > { %382 = vmatpush.msra.mxu2 %v879_v20  ;;  %220 = vst.msk [vmem:[#allocation2 + $0x9] sm:$0xf] %vm219_vm1, %v196_v24  ;;  %439 = vmatpush.msra.mxu3 %v892_v32  ;;  %v906_v43 = vld [vmem:[%s1564_s1 + $0x120] sm:$0xff]  ;;  %v945_v47 = vld [vmem:[%s1564_s1 + $0x1f8] sm:$0xff]  ;;  %v199_v48 = vld [vmem:[%s1207_s6 + $0xc] sm:$0xf] }
  0x22   : > { %976 = vmatpush.msra.mxu1 %v862_v22  ;;  %287 = vmatpush.msra.mxu0 %v862_v22  ;;  %212 = vst.msk [vmem:[#allocation2 + $0x18] sm:$0x1] %vm209_vm2, %v1093_v5  ;;  %v905_v49 = vld [vmem:[%s1564_s1 + $0x118] sm:$0xff]  ;;  %v930_v50 = vld [vmem:[%s1564_s1 + $0x1a0] sm:$0xff]  ;;  %v239_v51 = vld [vmem:[%s1564_s1 + $0x8] sm:$0xff]  ;;  %s1519_s6 = scalar_lea.vmem [#allocation3], %s859_s5 }
  0x23   : > { %872 = vmatmul.msk.f32.vlgmr.msra.gmra.mxu1 %vm200_vm0, %v1267_v25  ;;  %870 = vmatmul.msk.f32.vlgmr.msra.gmra.mxu0 %vm200_vm0, %v247_v23  ;;  %213 = vst.msk [vmem:[#allocation2 + $0x20] sm:$0x1] %vm209_vm2, %v1093_v5  ;;  %v1324_v40 = vld [vmem:[#allocation2 + $0x48] sm:$0xff]  ;;  %v944_v52 = vld [vmem:[%s1564_s1 + $0x1f0] sm:$0xff]  ;;  %v238_v54 = vld [vmem:[%s1564_s1] sm:$0xff]  ;;  %s790_s11 = sshll.u32 %s1519_s6, 4  ;;  %s791_s11 = int_to_ptr.vmem [resolvable:$true] %s790_s11 }
  0x24   : > { %321 = vmatpush.msrb.mxu1 %v245_v26  ;;  %383 = vmatpush.msra.mxu2 %v878_v27  ;;  %215 = vst.msk [vmem:[#allocation2 + $0x6b] sm:$0x1] %vm209_vm2, %v1093_v5  ;;  %v904_v53 = vld [vmem:[%s1564_s1 + $0x110] sm:$0xff]  ;;  %v943_v55 = vld [vmem:[%s1564_s1 + $0x1e8] sm:$0xff]  ;;  %v234_v56 = vld [vmem:[#allocation2] sm:$0xff] }
  0x25   : > { %492 = vmatpush.msrb.mxu0 %v909_v28  ;;  %886 = vmatmul.msk.f32.vlgmr.msra.gmra.mxu2 %vm200_vm0, %v343_v29  ;;  %216 = vst.msk [vmem:[#allocation2 + $0x73] sm:$0x1] %vm209_vm2, %v1093_v5  ;;  %v903_v58 = vld [vmem:[%s1564_s1 + $0x108] sm:$0xff]  ;;  %v921_v59 = vld [vmem:[%s1564_s1 + $0x178] sm:$0xff]  ;;  %v902_v61 = vld [vmem:[%s1564_s1 + $0x100] sm:$0xff] }
  0x26   : > { %322 = vmatpush.msrb.mxu1 %v244_v30  ;;  %609 = vmatpush.msrb.mxu2 %v933_v31  ;;  %217 = vst.msk [vmem:[#allocation2 + $0x7b] sm:$0x1] %vm209_vm2, %v1093_v5  ;;  %v929_v60 = vld [vmem:[%s1564_s1 + $0x198] sm:$0xff]  ;;  %v1396_v62 = vld [vmem:[#allocation2 + $0x10] sm:$0xff]  ;;  %v942_v0 = vld [vmem:[%s1564_s1 + $0x1e0] sm:$0xff] }
  0x27   : > { %493 = vmatpush.msrb.mxu0 %v908_v33  ;;  %218 = vst.msk [vmem:[#allocation2 + $0x83] sm:$0x1] %vm209_vm2, %v1093_v5  ;;  %440 = vmatpush.msra.mxu3 %v891_v36  ;;  %v248_v44 = vld [vmem:[#allocation2 + $0x38] sm:$0xff]  ;;  %v920_v63 = vld [vmem:[%s1564_s1 + $0x170] sm:$0xff]  ;;  %v919_v2 = vld [vmem:[%s1564_s1 + $0x168] sm:$0xff] }
  0x28   : > { %323 = vmatpush.msrb.mxu1 %v243_v34  ;;  %610 = vmatpush.msrb.mxu2 %v932_v35  ;;  %230 = vst.msk [vmem:[#allocation2 + $0x67] sm:$0xe] %vm229_vm3, %v196_v24  ;;  %v1338_v45 = vld [vmem:[#allocation2 + $0x8] sm:$0xff]  ;;  %v928_v1 = vld [vmem:[%s1564_s1 + $0x190] sm:$0xff]  ;;  %v957_v3 = vld [vmem:[%s1564_s1 + $0x238] sm:$0xff] }
  0x29   : > { %494 = vmatpush.msrb.mxu0 %v907_v37  ;;  %231 = vst.msk [vmem:[#allocation2 + $0x6f] sm:$0xe] %vm229_vm3, %v1218_v12  ;;  %441 = vmatpush.msra.mxu3 %v890_v41  ;;  %v941_v5 = vld [vmem:[%s1564_s1 + $0x1d8] sm:$0xff]  ;;  %v918_v6 = vld [vmem:[%s1564_s1 + $0x160] sm:$0xff]  ;;  %v927_v7 = vld [vmem:[%s1564_s1 + $0x188] sm:$0xff] }
  0x2a   : > { %324 = vmatpush.msrb.mxu1 %v242_v38  ;;  %611 = vmatpush.msrb.mxu2 %v931_v39  ;;  %232 = vst.msk [vmem:[#allocation2 + $0x77] sm:$0xe] %vm229_vm3, %v1244_v18  ;;  %v940_v8 = vld [vmem:[%s1564_s1 + $0x1d0] sm:$0xff]  ;;  %v917_v9 = vld [vmem:[%s1564_s1 + $0x158] sm:$0xff]  ;;  %v926_v12 = vld [vmem:[%s1564_s1 + $0x180] sm:$0xff] }
  0x2b   : > { %873 = vmatmul.msk.f32.gmra.mxu1 %vm200_vm0, %v1324_v40  ;;  %495 = vmatpush.msrb.mxu0 %v906_v43  ;;  %223 = vst.msk [vmem:[#allocation2 + $0x21] sm:$0xf] %vm219_vm1, %v199_v48  ;;  %v956_v10 = vld [vmem:[%s1564_s1 + $0x230] sm:$0xff]  ;;  %v403_v11 = vld [vmem:[#allocation2 + $0x18] sm:$0xff]  ;;  %v939_v14 = vld [vmem:[%s1564_s1 + $0x1c8] sm:$0xff] }
  0x2c   : > { %325 = vmatpush.msrb.mxu1 %v241_v42  ;;  %871 = vmatmul.msk.f32.gmra.mxu0 %vm200_vm0, %v248_v44  ;;  %228 = vst.msk [vmem:[#allocation2 + $0x50] sm:$0xf] %vm219_vm1, %v199_v48  ;;  %v916_v13 = vld [vmem:[%s1564_s1 + $0x150] sm:$0xff]  ;;  %v955_v15 = vld [vmem:[%s1564_s1 + $0x228] sm:$0xff]  ;;  %v938_v18 = vld [vmem:[%s1564_s1 + $0x1c0] sm:$0xff] }
  0x2d   : > { %898 = vmatmul.msk.f32.vlgmr.msra.gmra.mxu3 %vm200_vm0, %v1338_v45  ;;  %233 = vst.msk [vmem:[#allocation2 + $0x7f] sm:$0xe] %vm229_vm3, %v199_v48  ;;  %496 = vmatpush.msrb.mxu0 %v905_v49  ;;  %v915_v16 = vld [vmem:[%s1564_s1 + $0x148] sm:$0xff]  ;;  %v954_v19 = vld [vmem:[%s1564_s1 + $0x220] sm:$0xff]  ;;  %v953_v21 = vld [vmem:[%s1564_s1 + $0x218] sm:$0xff] }
  0x2e   : > { %326 = vmatpush.msrb.mxu1 %v240_v46  ;;  %668 = vmatpush.msrb.mxu3 %v945_v47  ;;  %v914_v20 = vld [vmem:[%s1564_s1 + $0x140] sm:$0xff]  ;;  %v952_v23 = vld [vmem:[%s1564_s1 + $0x210] sm:$0xff]  ;;  %v951_v24 = vld [vmem:[%s1564_s1 + $0x208] sm:$0xff] }
  0x2f   : > { %612 = vmatpush.msrb.mxu2 %v930_v50  ;;  %v1380_v57 = vld [vmem:[#allocation2 + $0x68] sm:$0xff]  ;;  %497 = vmatpush.msrb.mxu0 %v904_v53  ;;  %v950_v26 = vld [vmem:[%s1564_s1 + $0x200] sm:$0xff]  ;;  %v638_v28 = vld [vmem:[#allocation2 + $0x58] sm:$0xff] }
  0x30   : > { %327 = vmatpush.msrb.mxu1 %v239_v51  ;;  %669 = vmatpush.msrb.mxu3 %v944_v52  ;;  %v1417_v4 = vld [vmem:[#allocation2 + $0x70] sm:$0xff]  ;;  %v697_v30 = vld [vmem:[#allocation2 + $0x88] sm:$0xff] }
  0x31   : > { %887 = vmatmul.msk.f32.gmra.mxu2 %vm200_vm0, %v1380_v57  ;;  %498 = vmatpush.msrb.mxu0 %v903_v58  ;;  %v346_v17 = vld [vmem:[#allocation2 + $0x78] sm:$0xff] }
  0x32   : > { %328 = vmatpush.msrb.mxu1 %v238_v54  ;;  %670 = vmatpush.msrb.mxu3 %v943_v55  ;;  %v404_v22 = vld [vmem:[#allocation2 + $0x20] sm:$0xff] }
  0x33   : > { %874 = vmatmul.msk.f32.vlgmr.msrb.gmra.mxu1 %vm200_vm0, %v234_v56  ;;  %613 = vmatpush.msrb.mxu2 %v929_v60  ;;  %v462_v27 = vld [vmem:[#allocation2 + $0x50] sm:$0xff] }
  0x34   : > { %550 = vmatpush.msra.mxu1 %v921_v59  ;;  %499 = vmatpush.msrb.mxu0 %v902_v61  ;;  %v696_v29 = vld [vmem:[#allocation2 + $0x80] sm:$0xff] }
  0x35   : > { %899 = vmatmul.msk.f32.gmra.mxu3 %vm200_vm0, %v1396_v62  ;;  %910 = vmatmul.msk.f32.vlgmr.msrb.gmra.mxu0 %vm200_vm0, %v248_v44 }
  0x36   : > { %551 = vmatpush.msra.mxu1 %v920_v63  ;;  %671 = vmatpush.msrb.mxu3 %v942_v0 }
  0x37   : > { %614 = vmatpush.msrb.mxu2 %v928_v1  ;;  %727 = vmatpush.msra.mxu0 %v957_v3 }
  0x38   : > { %552 = vmatpush.msra.mxu1 %v919_v2  ;;  %672 = vmatpush.msrb.mxu3 %v941_v5 }
  0x39   : > { %888 = vmatmul.msk.f32.gmra.mxu2 %vm200_vm0, %v1417_v4  ;;  %728 = vmatpush.msra.mxu0 %v956_v10 }
  0x3a   : > { %553 = vmatpush.msra.mxu1 %v918_v6  ;;  %615 = vmatpush.msrb.mxu2 %v927_v7  ;;  %v1028_v7 = vld [vmem:[%s1566_s3] ss:$0 sm:$0xff] }
  0x3b   : > { %875 = vmatmul.msk.f32.gmra.mxu1 %vm200_vm0, %v1338_v45  ;;  %673 = vmatpush.msrb.mxu3 %v940_v8 }
  0x3c   : > { %554 = vmatpush.msra.mxu1 %v917_v9  ;;  %616 = vmatpush.msrb.mxu2 %v926_v12 }
  0x3d   : > { %900 = vmatmul.msk.f32.gmra.mxu3 %vm200_vm0, %v403_v11  ;;  %911 = vmatmul.msk.f32.gmra.mxu0 %vm200_vm0, %v1267_v25 }
  0x3e   : > { %555 = vmatpush.msra.mxu1 %v916_v13  ;;  %674 = vmatpush.msrb.mxu3 %v939_v14 }
  0x3f   : > { %729 = vmatpush.msra.mxu0 %v955_v15  ;;  %977 = vmatpush.msra.mxu2 %v957_v3  ;;  %v1027_v3 = vld [vmem:[%s1565_s2] ss:$0 sm:$0xff] }
  0x40   : > { %556 = vmatpush.msra.mxu1 %v915_v16  ;;  %675 = vmatpush.msrb.mxu3 %v938_v18 }
  0x41   : > { %889 = vmatmul.msk.f32.gmra.mxu2 %vm200_vm0, %v346_v17  ;;  %730 = vmatpush.msra.mxu0 %v954_v19 }
  0x42   : > { %557 = vmatpush.msra.mxu1 %v914_v20  ;;  %978 = vmatpush.msra.mxu2 %v956_v10 }
  0x43   : > { %876 = vmatmul.msk.f32.gmra.mxu1 %vm200_vm0, %v1396_v62  ;;  %731 = vmatpush.msra.mxu0 %v953_v21 }
  0x44   : > { %979 = vmatpush.msra.mxu2 %v955_v15 }
  0x45   : > { %901 = vmatmul.msk.f32.gmra.mxu3 %vm200_vm0, %v404_v22  ;;  %912 = vmatmul.msk.f32.gmra.mxu0 %vm200_vm0, %v1324_v40 }
  0x46   : > { %732 = vmatpush.msra.mxu0 %v952_v23  ;;  %980 = vmatpush.msra.mxu2 %v954_v19 }
  0x48   : > { %733 = vmatpush.msra.mxu0 %v951_v24  ;;  %981 = vmatpush.msra.mxu2 %v953_v21 }
  0x49   : > { %934 = vmatmul.msk.f32.vlgmr.msrb.gmra.mxu2 %vm200_vm0, %v1396_v62 }
  0x4a   : > { %734 = vmatpush.msra.mxu0 %v950_v26  ;;  %982 = vmatpush.msra.mxu2 %v952_v23 }
  0x4b   : > { %877 = vmatmul.msk.f32.gmra.mxu1 %vm200_vm0, %v403_v11 }
  0x4c   : > { %983 = vmatpush.msra.mxu2 %v951_v24 }
  0x4d   : > { %946 = vmatmul.msk.f32.vlgmr.msrb.gmra.mxu3 %vm200_vm0, %v1267_v25  ;;  %913 = vmatmul.msk.f32.gmra.mxu0 %vm200_vm0, %v462_v27  ;;  %v579_v25 = vld [vmem:[#allocation2 + $0x28] sm:$0xff] }
  0x4e   : > { %984 = vmatpush.msra.mxu2 %v950_v26 }
  0x51   : > { %935 = vmatmul.msk.f32.gmra.mxu2 %vm200_vm0, %v403_v11 }
  0x53   : > { %922 = vmatmul.msk.f32.vlgmr.msra.gmra.mxu1 %vm200_vm0, %v1380_v57 }
  0x55   : > { %947 = vmatmul.msk.f32.gmra.mxu3 %vm200_vm0, %v1324_v40  ;;  %958 = vmatmul.msk.f32.vlgmr.msra.gmra.mxu0 %vm200_vm0, %v1417_v4 }
  0x59   : > { %936 = vmatmul.msk.f32.gmra.mxu2 %vm200_vm0, %v404_v22 }
  0x5b   : > { %923 = vmatmul.msk.f32.gmra.mxu1 %vm200_vm0, %v1417_v4 }
  0x5d   : > { %948 = vmatmul.msk.f32.gmra.mxu3 %vm200_vm0, %v462_v27  ;;  %959 = vmatmul.msk.f32.gmra.mxu0 %vm200_vm0, %v346_v17 }
  0x61   : > { %937 = vmatmul.msk.f32.gmra.mxu2 %vm200_vm0, %v579_v25 }
  0x63   : > { %924 = vmatmul.msk.f32.gmra.mxu1 %vm200_vm0, %v346_v17 }
  0x65   : > { %949 = vmatmul.msk.f32.gmra.mxu3 %vm200_vm0, %v638_v28  ;;  %960 = vmatmul.msk.f32.gmra.mxu0 %vm200_vm0, %v696_v29 }
  0x69   : > { %961 = vmatmul.msk.f32.vlgmr.msra.gmra.mxu2 %vm200_vm0, %v697_v30 }
  0x6b   : > { %925 = vmatmul.msk.f32.gmra.mxu1 %vm200_vm0, %v696_v29 }
  0xa0   : > { %v295_v31 = vpop.f32.mrf.mxu1  ;;  %v289_v32 = vpop.f32.mrf.mxu0 }
  0xa8   : > { %v298_v33 = vpop.f32.mrf.mxu1  ;;  %v385_v35 = vpop.f32.mrf.mxu2 }
  0xa9   : > { %v292_v34 = vpop.f32.mrf.mxu0 }
  0xb0   : > { %v330_v36 = vpop.f32.mrf.mxu1  ;;  %v443_v37 = vpop.f32.mrf.mxu3 }
  0xb1   : > { %v331_v46 = vadd.f32 %v330_v36, %v289_v32 }
  0xb2   : > { %v501_v38 = vpop.f32.mrf.mxu0 }
  0xb3   : > { %v397_v49 = vadd.f32 %v385_v35, %v331_v46 }
  0xb4   : > { %v388_v39 = vpop.f32.mrf.mxu2 }
  0xb5   : > { %v455_v52 = vadd.f32 %v443_v37, %v397_v49 }
  0xb7   : > { %v513_v56 = vadd.f32 %v501_v38, %v455_v52 }
  0xb8   : > { %v333_v40 = vpop.f32.mrf.mxu1  ;;  %v446_v41 = vpop.f32.mrf.mxu3 }
  0xb9   : > { %v334_v53 = vadd.f32 %v333_v40, %v292_v34 }
  0xba   : > { %v504_v42 = vpop.f32.mrf.mxu0 }
  0xbb   : > { %v398_v57 = vadd.f32 %v388_v39, %v334_v53 }
  0xbc   : > { %v391_v43 = vpop.f32.mrf.mxu2 }
  0xbd   : > { %v456_v61 = vadd.f32 %v446_v41, %v398_v57 }
  0xbf   : > { %v514_v4 = vadd.f32 %v504_v42, %v456_v61 }
  0xc0   : > { %v336_v44 = vpop.f32.mrf.mxu1  ;;  %v449_v45 = vpop.f32.mrf.mxu3 }
  0xc1   : > { %v337_v62 = vadd.f32 %v336_v44, %v295_v31 }
  0xc2   : > { %v507_v47 = vpop.f32.mrf.mxu0 }
  0xc3   : > { %v399_v5 = vadd.f32 %v391_v43, %v337_v62 }
  0xc4   : > { %v394_v48 = vpop.f32.mrf.mxu2 }
  0xc5   : > { %v457_v12 = vadd.f32 %v449_v45, %v399_v5 }
  0xc7   : > { %v515_v20 = vadd.f32 %v507_v47, %v457_v12 }
  0xc8   : > { %v339_v50 = vpop.f32.mrf.mxu1  ;;  %v452_v51 = vpop.f32.mrf.mxu3 }
  0xc9   : > { %v340_v13 = vadd.f32 %v339_v50, %v298_v33 }
  0xca   : > { %v510_v54 = vpop.f32.mrf.mxu0 }
  0xcb   : > { %v400_v21 = vadd.f32 %v394_v48, %v340_v13 }
  0xcc   : > { %v618_v55 = vpop.f32.mrf.mxu2 }
  0xcd   : > { %v458_v25 = vadd.f32 %v452_v51, %v400_v21 }
  0xcf   : > { %v516_v34 = vadd.f32 %v510_v54, %v458_v25 }
  0xd0   : > { %v559_v58 = vpop.f32.mrf.mxu1  ;;  %v677_v59 = vpop.f32.mrf.mxu3 }
  0xd1   : > { %v571_v60 = vadd.f32 %v559_v58, %v513_v56 }
  0xd2   : > { %v736_v0 = vpop.f32.mrf.mxu0 }
  0xd3   : > { %v630_v63 = vadd.f32 %v618_v55, %v571_v60 }
  0xd4   : > { %v621_v1 = vpop.f32.mrf.mxu2 }
  0xd5   : > { %v689_v2 = vadd.f32 %v677_v59, %v630_v63 }
  0xd7   : > { %v748_v6 = vadd.f32 %v736_v0, %v689_v2 }
  0xd8   : > { %v562_v8 = vpop.f32.mrf.mxu1  ;;  %v680_v9 = vpop.f32.mrf.mxu3 }
  0xd9   : > { %v756_v10 = vmul.f32 %v1027_v3, %v748_v6  ;;  %v572_v11 = vadd.f32 %v562_v8, %v514_v4 }
  0xda   : > { %v739_v16 = vpop.f32.mrf.mxu0 }
  0xdb   : > { %v764_v14 = vadd.f32 %v1028_v7, %v756_v10  ;;  %v631_v15 = vadd.f32 %v621_v1, %v572_v11 }
  0xdc   : > { %v624_v17 = vpop.f32.mrf.mxu2 }
  0xdd   : > { %v768_v18 = vmax.f32 %v764_v14, 0.0  ;;  %v690_v19 = vadd.f32 %v680_v9, %v631_v15 }
  0xdf   : > { %773 = vst.msk [vmem:[%s1519_s6] sm:$0xf] %vm772_vm4, %v768_v18  ;;  %v749_v22 = vadd.f32 %v739_v16, %v690_v19 }
  0xe0   : > { %v565_v23 = vpop.f32.mrf.mxu1  ;;  %v683_v24 = vpop.f32.mrf.mxu3 }
  0xe1   : > { %v757_v26 = vmul.f32 %v1027_v3, %v749_v22  ;;  %v573_v27 = vadd.f32 %v565_v23, %v515_v20 }
  0xe2   : > { %v742_v31 = vpop.f32.mrf.mxu0 }
  0xe3   : > { %v765_v28 = vadd.f32 %v1028_v7, %v757_v26  ;;  %v632_v29 = vadd.f32 %v624_v17, %v573_v27 }
  0xe4   : > { %v627_v30 = vpop.f32.mrf.mxu2 }
  0xe5   : > { %v769_v32 = vmax.f32 %v765_v28, 0.0  ;;  %v691_v33 = vadd.f32 %v683_v24, %v632_v29 }
  0xe7   : > { %774 = vst.msk [vmem:[%s1519_s6 + $0x4] sm:$0xf] %vm772_vm4, %v769_v32  ;;  %v750_v35 = vadd.f32 %v742_v31, %v691_v33 }
  0xe8   : > { %v568_v36 = vpop.f32.mrf.mxu1  ;;  %v686_v39 = vpop.f32.mrf.mxu3 }
  0xe9   : > { %v758_v37 = vmul.f32 %v1027_v3, %v750_v35  ;;  %v574_v38 = vadd.f32 %v568_v36, %v516_v34 }
  0xeb   : > { %v766_v40 = vadd.f32 %v1028_v7, %v758_v37  ;;  %v633_v41 = vadd.f32 %v627_v30, %v574_v38 }
  0xec   : > { %v745_v42 = vpop.f32.mrf.mxu2 }
  0xed   : > { %v770_v43 = vmax.f32 %v766_v40, 0.0  ;;  %v692_v44 = vadd.f32 %v686_v39, %v633_v41 }
  0xef   : > { %775 = vst.msk [vmem:[%s1519_s6 + $0x8] sm:$0xf] %vm772_vm4, %v770_v43  ;;  %v751_v45 = vadd.f32 %v745_v42, %v692_v44 }
  0xf1   : > { %v759_v46 = vmul.f32 %v1027_v3, %v751_v45 }
  0xf3   : > { %v767_v47 = vadd.f32 %v1028_v7, %v759_v46 }
  0xf5   : > { %v771_v48 = vmax.f32 %v767_v47, 0.0 }
  0xf7   : > { %776 = vst.msk [vmem:[%s1519_s6 + $0xc] sm:$0xf] %vm772_vm4, %v771_v48 }
  0xf8   : > { %1056 = shalt.err (!%p1053_p3)
}
  0xf9   : > { %s1094_s28 = smov 64   ;;  %s1095_s30 = smov 4  }
  0xfa   : > { %985 = dma.vmem_to_hbm [thread:$0]  (%p1159_p5), %s791_s11, 256, %s793_s12, %s778_s19, %s1094_s28, %s1094_s28, %s1095_s30  }
  0xfb PF: > { %p991_p4 = scmp.ge.s32.totalorder %s1091_s18, 2  ;;  %s807_s5 = sand.u32 1, %s1079_s15  }
  0xfc   : > { %s808_s6 = scalar_lea.sflag [#allocation4], %s807_s5 }
  0xfd   : > { %p988_p7 = pnand %p991_p4, %p1163_p6 }
  0xff   : > { %p989_p8 = pneg %p988_p7 }
 0x101   : > { %1074 = dma.done.wait (%p989_p8), %s808_s6, 256  }
 0x102   : > { %1076 = vsyncadd (%p989_p8), %s808_s6, 4294967040  ;;  %p14_p9 = scmp.ge.s32.totalorder %s1146_s21, 4   ;;  %s1570_s15 = smov %s1083_s16 }
 0x103   : > { %s1571_s16 = smov %s1087_s17  ;;  %s1572_s17 = smov %s1157_s24 }
 0x104   : > { %s1573_s18 = smov %s1146_s21  ;;  %16 = sbr.rel (!%p14_p9) target bundleno = 3 (0x3), region = 88 }
 0x109   :  { %814 = vsyncpa [#allocation4], 1 }
 0x10a   :  { %816 = vsyncpa [#allocation4 + $0x1], 1 }

</bundles_post_ra>
